<compile_context>
chip_gen: v5e
topology: v5e:2x2
jax: 0.10.0
libtpu: 0.0.40
codegen_flags: <defaults>
</compile_context>

<pallas_src>
import jax
import jax.numpy as jnp
from jax.experimental import pallas as pl
from jax.experimental.pallas import tpu as pltpu


def qnetwork_kernel(x_ref, w1_ref, b1_ref, w2_ref, b2_ref, w3_ref, b3_ref,
                    out_ref):
    """Full MLP forward on one batch tile: (Linear+ReLU) x2 + final Linear."""
    cdt = w1_ref.dtype  # compute (matmul-input) dtype, e.g. bfloat16

    x = x_ref[...]

    # Layer 1: Linear + ReLU  (bf16 inputs, f32 accumulate)
    h1 = jnp.dot(x, w1_ref[...], preferred_element_type=jnp.float32)
    h1 = jnp.maximum(h1 + b1_ref[...], 0.0).astype(cdt)

    # Layer 2: Linear + ReLU
    h2 = jnp.dot(h1, w2_ref[...], preferred_element_type=jnp.float32)
    h2 = jnp.maximum(h2 + b2_ref[...], 0.0).astype(cdt)

    # Output layer: Linear (raw Q-values, exact action_dim lanes)
    q = jnp.dot(h2, w3_ref[...], preferred_element_type=jnp.float32)
    q = q + b3_ref[...]

    out_ref[...] = q.astype(out_ref.dtype)


def _round_up(n, m):
    return ((n + m - 1) // m) * m


def prepare_params(params, compute_dtype=jnp.bfloat16):
    """One-time (per training step) cast of weights to the MXU input dtype.

    Hoisted out of qnetwork_forward so the per-call path does no weight
    reshaping/casting work. Biases stay float32 (added to f32 accumulations).
    """
    return {
        "w1": params["w1"].astype(compute_dtype),
        "w2": params["w2"].astype(compute_dtype),
        "w3": params["w3"].astype(compute_dtype),
        "b1": params["b1"].astype(jnp.float32),
        "b2": params["b2"].astype(jnp.float32),
        "b3": params["b3"].astype(jnp.float32),
    }


def _pick_tile(batch, tile_batch):
    """Batch tile: multiple of 8, large enough to amortize grid overhead,
    but guaranteeing >= 2 grid steps for batches >= 512 (v7x megacore)."""
    rows = _round_up(batch, 8)
    tb = max(8, min(_round_up(tile_batch, 8), rows))
    if rows >= 512:
        tb = min(tb, _round_up((rows + 1) // 2, 8))
    return tb


def qnetwork_forward(x, prepared, tile_batch=4096):
    """Fused QNetwork forward.

    x:        [batch, state_dim] float32 (cast to the weights' dtype per call)
    prepared: output of prepare_params(); w* are [in, out] (= torch W.T),
              b* are [1, out] float32.
    returns   [batch, action_dim] float32 Q-values.
    """
    batch, state_dim = x.shape
    w1, b1 = prepared["w1"], prepared["b1"]
    w2, b2 = prepared["w2"], prepared["b2"]
    w3, b3 = prepared["w3"], prepared["b3"]
    h1_dim = w1.shape[1]
    h2_dim = w2.shape[1]
    action_dim = w3.shape[1]
    compute_dtype = w1.dtype

    tb = _pick_tile(batch, tile_batch)
    batch_p = _round_up(batch, tb)

    xp = x.astype(compute_dtype)
    if batch_p != batch:
        xp = jnp.pad(xp, ((0, batch_p - batch), (0, 0)))

    grid = (batch_p // tb,)

    out = pl.pallas_call(
        qnetwork_kernel,
        out_shape=jax.ShapeDtypeStruct((batch_p, action_dim), jnp.float32),
        grid=grid,
        in_specs=[
            # Activations: tiled along batch, auto double-buffered.
            pl.BlockSpec((tb, state_dim), lambda i: (i, 0)),
            # Weights / biases: constant index_map -> VMEM-resident across grid.
            pl.BlockSpec((state_dim, h1_dim), lambda i: (0, 0)),
            pl.BlockSpec((1, h1_dim), lambda i: (0, 0)),
            pl.BlockSpec((h1_dim, h2_dim), lambda i: (0, 0)),
            pl.BlockSpec((1, h2_dim), lambda i: (0, 0)),
            pl.BlockSpec((h2_dim, action_dim), lambda i: (0, 0)),
            pl.BlockSpec((1, action_dim), lambda i: (0, 0)),
        ],
        # Unpadded output: block last dim == full array dim (action_dim).
        out_specs=pl.BlockSpec((tb, action_dim), lambda i: (i, 0)),
        compiler_params=pltpu.CompilerParams(
            dimension_semantics=("parallel",)),
    )(xp, w1, b1, w2, b2, w3, b3)

    return out[:batch] if batch_p != batch else out


def init_params(key, state_dim, action_dim, hidden_dims):
    """Deterministic PyTorch-style (uniform +-1/sqrt(fan_in)) init, float32."""
    dims = [state_dim] + list(hidden_dims) + [action_dim]
    params = {}
    for i, (d_in, d_out) in enumerate(zip(dims[:-1], dims[1:]), start=1):
        key, kw, kb = jax.random.split(key, 3)
        bound = 1.0 / jnp.sqrt(jnp.float32(d_in))
        # Stored as [in, out]  (== PyTorch weight.T)
        params[f"w{i}"] = jax.random.uniform(
            kw, (d_in, d_out), jnp.float32, minval=-bound, maxval=bound)
        params[f"b{i}"] = jax.random.uniform(
            kb, (1, d_out), jnp.float32, minval=-bound, maxval=bound)
    return params


def reference_forward(x, params):
    """Plain-JAX f32 reference for correctness check."""
    h = jnp.maximum(x @ params["w1"] + params["b1"], 0.0)
    h = jnp.maximum(h @ params["w2"] + params["b2"], 0.0)
    return h @ params["w3"] + params["b3"]


if __name__ == "__main__":
    # LunarLander-v2: state_dim=8, action_dim=4; two hidden layers of 128.
    state_dim, action_dim = 8, 4
    hidden_dims = (128, 128)

    key = jax.random.PRNGKey(0)
    key, kx = jax.random.split(key)
    params = init_params(key, state_dim, action_dim, hidden_dims)
    prepared = prepare_params(params)  # bf16 weights, cast once (hoisted)

    # Small-batch check (single grid step).
    x_small = jax.random.normal(kx, (32, state_dim), jnp.float32)
    q_small = jax.block_until_ready(qnetwork_forward(x_small, prepared))
    q_small_ref = reference_forward(x_small, params)
    assert q_small.shape == (32, action_dim)
    # bf16-input / f32-accumulate: compare against f32 reference with a
    # correspondingly looser tolerance.
    assert jnp.allclose(q_small, q_small_ref, atol=5e-2, rtol=5e-2), (
        float(jnp.max(jnp.abs(q_small - q_small_ref))))

    # Larger, non-multiple batch to exercise the multi-step grid + padding path
    # (600 rows with tile_batch=256 -> 3 grid steps, padded to 768).
    key, kx2 = jax.random.split(key)
    x_big = jax.random.normal(kx2, (600, state_dim), jnp.float32)
    q_big = jax.block_until_ready(
        qnetwork_forward(x_big, prepared, tile_batch=256))
    q_big_ref = reference_forward(x_big, params)
    assert q_big.shape == (600, action_dim)
    assert jnp.allclose(q_big, q_big_ref, atol=5e-2, rtol=5e-2), (
        float(jnp.max(jnp.abs(q_big - q_big_ref))))

    print("KERNEL_OK")
</pallas_src>

<mosaic_0001>
module attributes {stable_mosaic.version = 11 : i64} {
  func.func @qnetwork_kernel(%arg0: i32, %arg1: memref<32x8xbf16, #tpu.memory_space<vmem>>, %arg2: memref<8x128xbf16, #tpu.memory_space<vmem>>, %arg3: memref<1x128xf32, #tpu.memory_space<vmem>>, %arg4: memref<128x128xbf16, #tpu.memory_space<vmem>>, %arg5: memref<1x128xf32, #tpu.memory_space<vmem>>, %arg6: memref<128x4xbf16, #tpu.memory_space<vmem>>, %arg7: memref<1x4xf32, #tpu.memory_space<vmem>>, %arg8: memref<32x4xf32, #tpu.memory_space<vmem>>) attributes {dimension_semantics = [#tpu.dimension_semantics<parallel>], iteration_bounds = array<i64: 1>, scalar_prefetch = 0 : i64, scratch_operands = 0 : i64, tpu.core_type = #tpu.core_type<tc>, window_params = [{transform_indices = @transform_0, window_bounds = array<i64: 32, 8>}, {pipeline_mode = #tpu.pipeline_mode<synchronous>, transform_indices = @transform_1, window_bounds = array<i64: 8, 128>}, {pipeline_mode = #tpu.pipeline_mode<synchronous>, transform_indices = @transform_2, window_bounds = array<i64: 1, 128>}, {pipeline_mode = #tpu.pipeline_mode<synchronous>, transform_indices = @transform_3, window_bounds = array<i64: 128, 128>}, {pipeline_mode = #tpu.pipeline_mode<synchronous>, transform_indices = @transform_4, window_bounds = array<i64: 1, 128>}, {pipeline_mode = #tpu.pipeline_mode<synchronous>, transform_indices = @transform_5, window_bounds = array<i64: 128, 4>}, {pipeline_mode = #tpu.pipeline_mode<synchronous>, transform_indices = @transform_6, window_bounds = array<i64: 1, 4>}, {transform_indices = @transform_7, window_bounds = array<i64: 32, 4>}]} {
    %c0 = arith.constant 0 : index
    %c0_0 = arith.constant 0 : index
    %0 = vector.load %arg1[%c0, %c0_0] : memref<32x8xbf16, #tpu.memory_space<vmem>>, vector<32x8xbf16>
    %c0_1 = arith.constant 0 : index
    %c0_2 = arith.constant 0 : index
    %1 = vector.load %arg2[%c0_1, %c0_2] : memref<8x128xbf16, #tpu.memory_space<vmem>>, vector<8x128xbf16>
    %cst = arith.constant dense<0.000000e+00> : vector<32x128xf32>
    %2 = tpu.matmul %0, %1, %cst {dimension_numbers = #tpu.dot_dimension_numbers<[1], [0], [0], [1], [0, 0, 1, 1], [], []>} : vector<32x8xbf16>, vector<8x128xbf16>, vector<32x128xf32> -> vector<32x128xf32>
    %c0_3 = arith.constant 0 : index
    %c0_4 = arith.constant 0 : index
    %3 = vector.load %arg3[%c0_3, %c0_4] : memref<1x128xf32, #tpu.memory_space<vmem>>, vector<1x128xf32>
    %4 = vector.broadcast %3 : vector<1x128xf32> to vector<32x128xf32>
    %5 = arith.addf %2, %4 : vector<32x128xf32>
    %cst_5 = arith.constant 0.000000e+00 : f32
    %6 = vector.broadcast %cst_5 : f32 to vector<32x128xf32>
    %7 = arith.maximumf %5, %6 : vector<32x128xf32>
    %8 = arith.truncf %7 : vector<32x128xf32> to vector<32x128xbf16>
    %c0_6 = arith.constant 0 : index
    %c0_7 = arith.constant 0 : index
    %9 = vector.load %arg4[%c0_6, %c0_7] : memref<128x128xbf16, #tpu.memory_space<vmem>>, vector<128x128xbf16>
    %cst_8 = arith.constant dense<0.000000e+00> : vector<32x128xf32>
    %10 = tpu.matmul %8, %9, %cst_8 {dimension_numbers = #tpu.dot_dimension_numbers<[1], [0], [0], [1], [0, 0, 1, 1], [], []>} : vector<32x128xbf16>, vector<128x128xbf16>, vector<32x128xf32> -> vector<32x128xf32>
    %c0_9 = arith.constant 0 : index
    %c0_10 = arith.constant 0 : index
    %11 = vector.load %arg5[%c0_9, %c0_10] : memref<1x128xf32, #tpu.memory_space<vmem>>, vector<1x128xf32>
    %12 = vector.broadcast %11 : vector<1x128xf32> to vector<32x128xf32>
    %13 = arith.addf %10, %12 : vector<32x128xf32>
    %cst_11 = arith.constant 0.000000e+00 : f32
    %14 = vector.broadcast %cst_11 : f32 to vector<32x128xf32>
    %15 = arith.maximumf %13, %14 : vector<32x128xf32>
    %16 = arith.truncf %15 : vector<32x128xf32> to vector<32x128xbf16>
    %c0_12 = arith.constant 0 : index
    %c0_13 = arith.constant 0 : index
    %17 = vector.load %arg6[%c0_12, %c0_13] : memref<128x4xbf16, #tpu.memory_space<vmem>>, vector<128x4xbf16>
    %cst_14 = arith.constant dense<0.000000e+00> : vector<32x4xf32>
    %18 = tpu.matmul %16, %17, %cst_14 {dimension_numbers = #tpu.dot_dimension_numbers<[1], [0], [0], [1], [0, 0, 1, 1], [], []>} : vector<32x128xbf16>, vector<128x4xbf16>, vector<32x4xf32> -> vector<32x4xf32>
    %c0_15 = arith.constant 0 : index
    %c0_16 = arith.constant 0 : index
    %19 = vector.load %arg7[%c0_15, %c0_16] : memref<1x4xf32, #tpu.memory_space<vmem>>, vector<1x4xf32>
    %20 = vector.broadcast %19 : vector<1x4xf32> to vector<32x4xf32>
    %21 = arith.addf %18, %20 : vector<32x4xf32>
    %c0_17 = arith.constant 0 : index
    %c0_18 = arith.constant 0 : index
    %22 = vector.load %arg8[%c0_17, %c0_18] : memref<32x4xf32, #tpu.memory_space<vmem>>, vector<32x4xf32>
    tpu.vector_store %arg8[%c0_17, %c0_18], %21 {strides = array<i32>} : memref<32x4xf32, #tpu.memory_space<vmem>>, vector<32x4xf32>,
    return
  }
  func.func @transform_0(%arg0: i32) -> (i32, i32) {
    %c0_i32 = arith.constant 0 : i32
    %c0_i32_0 = arith.constant 0 : i32
    return %arg0, %c0_i32 : i32, i32
  }
  func.func @transform_1(%arg0: i32) -> (i32, i32) {
    %c0_i32 = arith.constant 0 : i32
    %c0_i32_0 = arith.constant 0 : i32
    %c0_i32_1 = arith.constant 0 : i32
    return %c0_i32, %c0_i32_0 : i32, i32
  }
  func.func @transform_2(%arg0: i32) -> (i32, i32) {
    %c0_i32 = arith.constant 0 : i32
    %c0_i32_0 = arith.constant 0 : i32
    %c0_i32_1 = arith.constant 0 : i32
    return %c0_i32, %c0_i32_0 : i32, i32
  }
  func.func @transform_3(%arg0: i32) -> (i32, i32) {
    %c0_i32 = arith.constant 0 : i32
    %c0_i32_0 = arith.constant 0 : i32
    %c0_i32_1 = arith.constant 0 : i32
    return %c0_i32, %c0_i32_0 : i32, i32
  }
  func.func @transform_4(%arg0: i32) -> (i32, i32) {
    %c0_i32 = arith.constant 0 : i32
    %c0_i32_0 = arith.constant 0 : i32
    %c0_i32_1 = arith.constant 0 : i32
    return %c0_i32, %c0_i32_0 : i32, i32
  }
  func.func @transform_5(%arg0: i32) -> (i32, i32) {
    %c0_i32 = arith.constant 0 : i32
    %c0_i32_0 = arith.constant 0 : i32
    %c0_i32_1 = arith.constant 0 : i32
    return %c0_i32, %c0_i32_0 : i32, i32
  }
  func.func @transform_6(%arg0: i32) -> (i32, i32) {
    %c0_i32 = arith.constant 0 : i32
    %c0_i32_0 = arith.constant 0 : i32
    %c0_i32_1 = arith.constant 0 : i32
    return %c0_i32, %c0_i32_0 : i32, i32
  }
  func.func @transform_7(%arg0: i32) -> (i32, i32) {
    %c0_i32 = arith.constant 0 : i32
    %c0_i32_0 = arith.constant 0 : i32
    return %arg0, %c0_i32 : i32, i32
  }
}

</mosaic_0001>

<bundles_post_ra>
// kernel: tpu_custom_call.1
= control target key start
LH: loop header
LB: loop body
LE: loop exit
PB: predicated region body
PF: predicated region fallthrough
CT: control target
= control target key end

     0   :  { %vm53_vm0 = vcmask 1043456   ;;  %vm46_vm1 = vcmask 64512   ;;  %vm262_vm2 = vcmask 31744   ;;  %s500_s1 = inlined_call_operand.vmem [shape: bf16[8,128], index: 1, kind: input, shape index: {}]   ;;  %s501_s0 = inlined_call_operand.vmem [shape: bf16[32,8], index: 0, kind: input, shape index: {}]   ;;  %s502_s3 = inlined_call_operand.vmem [shape: bf16[128,128], index: 3, kind: input, shape index: {}]   ;;  %s503_s2 = inlined_call_operand.vmem [shape: f32[1,128], index: 2, kind: input, shape index: {}]   ;;  %s504_s4 = inlined_call_operand.vmem [shape: f32[1,128], index: 4, kind: input, shape index: {}]   ;;  %s505_s5 = inlined_call_operand.vmem [shape: bf16[128,4], index: 5, kind: input, shape index: {}]   ;;  %s506_s6 = inlined_call_operand.vmem [shape: f32[1,4], index: 6, kind: input, shape index: {}]   ;;  %s507_s7 = inlined_call_operand.vmem [shape: f32[32,4], index: 7, kind: output, shape index: {}]  }
   0x1   :  { %v31_v0 = vld [vmem:[%s500_s1] sm:$0xf]  ;;  %v354_v3 = vld [vmem:[%s502_s3 + $0x38] sm:$0xff]  ;;  %v353_v4 = vld [vmem:[%s502_s3 + $0x30] sm:$0xff] }
   0x2   :  { %v55_v1 = vsel %vm53_vm0, %v31_v0, 0  ;;  %v345_v2 = vld [vmem:[%s501_s0] sm:$0xff]  ;;  %150 = vmatpush.bf16.msra.mxu1 %v354_v3  ;;  %363 = vmatpush.bf16.msra.mxu3 %v354_v3  ;;  %v352_v5 = vld [vmem:[%s502_s3 + $0x28] sm:$0xff]  ;;  %v350_v8 = vld [vmem:[%s502_s3 + $0x18] sm:$0xff] }
   0x3   :  { %64 = vmatpush.bf16.msra.mxu0 %v55_v1  ;;  %v351_v6 = vld [vmem:[%s502_s3 + $0x20] sm:$0xff]  ;;  %v346_v7 = vld [vmem:[%s501_s0 + $0x8] sm:$0xff]  ;;  %v349_v9 = vld [vmem:[%s502_s3 + $0x10] sm:$0xff] }
   0x4   :  { %v348_v10 = vld [vmem:[%s502_s3 + $0x8] sm:$0xff]  ;;  %v347_v11 = vld [vmem:[%s502_s3] sm:$0xff]  ;;  %v362_v12 = vld [vmem:[%s505_s5 + $0x38] sm:$0xff] }
   0x5   :  { %v361_v14 = vld [vmem:[%s505_s5 + $0x30] sm:$0xff]  ;;  %371 = vmatpush.bf16.msra.mxu2 %v362_v12  ;;  %v379_v15 = vld [vmem:[%s503_s2] ss:$0 sm:$0xff]  ;;  %v360_v16 = vld [vmem:[%s505_s5 + $0x28] sm:$0xff] }
   0x6   :  { %279 = vmatmul.msk.bf16.vlgmr.msra.gmra.mxu0 %vm46_vm1, %v345_v2  ;;  %151 = vmatpush.bf16.msra.mxu1 %v353_v4  ;;  %v359_v20 = vld [vmem:[%s505_s5 + $0x20] sm:$0xff]  ;;  %v358_v31 = vld [vmem:[%s505_s5 + $0x18] sm:$0xff]  ;;  %v357_v32 = vld [vmem:[%s505_s5 + $0x10] sm:$0xff] }
   0x7   :  { %364 = vmatpush.bf16.msra.mxu3 %v353_v4  ;;  %243 = vmatpush.bf16.msrb.mxu0 %v362_v12  ;;  %v356_v33 = vld [vmem:[%s505_s5 + $0x8] sm:$0xff]  ;;  %v355_v34 = vld [vmem:[%s505_s5] sm:$0xff] }
   0x8   :  { %v380_v36 = vld [vmem:[%s504_s4] ss:$0 sm:$0xff] }
   0x9   :  { %372 = vmatpush.bf16.msra.mxu2 %v361_v14  ;;  %v381_v50 = vld [vmem:[%s506_s6] ss:$0 sm:$0xff] }
   0xa   :  { %152 = vmatpush.bf16.msra.mxu1 %v352_v5 }
   0xb   :  { %365 = vmatpush.bf16.msra.mxu3 %v352_v5  ;;  %244 = vmatpush.bf16.msrb.mxu0 %v361_v14 }
   0xd   :  { %373 = vmatpush.bf16.msra.mxu2 %v360_v16 }
   0xe   :  { %153 = vmatpush.bf16.msra.mxu1 %v351_v6 }
   0xf   :  { %366 = vmatpush.bf16.msra.mxu3 %v351_v6  ;;  %245 = vmatpush.bf16.msrb.mxu0 %v360_v16 }
  0x11   :  { %374 = vmatpush.bf16.msra.mxu2 %v359_v20 }
  0x12   :  { %154 = vmatpush.bf16.msra.mxu1 %v350_v8 }
  0x13   :  { %367 = vmatpush.bf16.msra.mxu3 %v350_v8  ;;  %246 = vmatpush.bf16.msrb.mxu0 %v359_v20 }
  0x15   :  { %375 = vmatpush.bf16.msra.mxu2 %v358_v31 }
  0x16   :  { %280 = vmatmul.msk.bf16.gmra.mxu0 %vm46_vm1, %v346_v7  ;;  %155 = vmatpush.bf16.msra.mxu1 %v349_v9 }
  0x17   :  { %368 = vmatpush.bf16.msra.mxu3 %v349_v9  ;;  %247 = vmatpush.bf16.msrb.mxu0 %v358_v31 }
  0x19   :  { %376 = vmatpush.bf16.msra.mxu2 %v357_v32 }
  0x1a   :  { %156 = vmatpush.bf16.msra.mxu1 %v348_v10 }
  0x1b   :  { %369 = vmatpush.bf16.msra.mxu3 %v348_v10  ;;  %248 = vmatpush.bf16.msrb.mxu0 %v357_v32 }
  0x1d   :  { %377 = vmatpush.bf16.msra.mxu2 %v356_v33 }
  0x1e   :  { %157 = vmatpush.bf16.msra.mxu1 %v347_v11 }
  0x1f   :  { %370 = vmatpush.bf16.msra.mxu3 %v347_v11  ;;  %249 = vmatpush.bf16.msrb.mxu0 %v356_v33 }
  0x21   :  { %378 = vmatpush.bf16.msra.mxu2 %v355_v34 }
  0x23   :  { %250 = vmatpush.bf16.msrb.mxu0 %v355_v34 }
  0x83   :  { %v66_v13 = vpop.f32.mrf.mxu0 }
  0x84   :  { %v67_v17 = vadd.f32 %v379_v15, %v66_v13 }
  0x86   :  { %v76_v21 = vmax.f32 %v67_v17, 0.0 }
  0x8b   :  { %v68_v18 = vpop.f32.mrf.mxu0 }
  0x8c   :  { %v69_v19 = vadd.f32 %v379_v15, %v68_v18 }
  0x8e   :  { %v77_v22 = vmax.f32 %v69_v19, 0.0 }
  0x90   :  { %v80_v23 = vpack.c.bf16 %v77_v22, %v76_v21 }
  0x92   :  { %158 = vmatmul.bf16.vlgmr.msra.gmra.mxu1 %v80_v23 }
  0x93   :  { %v71_v24 = vpop.f32.mrf.mxu0 }
  0x94   :  { %v72_v25 = vadd.f32 %v379_v15, %v71_v24 }
  0x96   :  { %v78_v28 = vmax.f32 %v72_v25, 0.0 }
  0x9b   :  { %v73_v26 = vpop.f32.mrf.mxu0 }
  0x9c   :  { %v74_v27 = vadd.f32 %v379_v15, %v73_v26 }
  0x9e   :  { %v79_v29 = vmax.f32 %v74_v27, 0.0 }
  0xa0   :  { %v81_v30 = vpack.c.bf16 %v79_v29, %v78_v28 }
  0xa2   :  { %163 = vmatmul.bf16.vlgmr.msra.gmra.mxu3 %v81_v30 }
 0x10f   :  { %v159_v35 = vpop.f32.mrf.mxu1 }
 0x110   :  { %v160_v37 = vadd.f32 %v380_v36, %v159_v35 }
 0x112   :  { %v169_v40 = vmax.f32 %v160_v37, 0.0 }
 0x117   :  { %v161_v38 = vpop.f32.mrf.mxu1 }
 0x118   :  { %v162_v39 = vadd.f32 %v380_v36, %v161_v38 }
 0x11a   :  { %v170_v41 = vmax.f32 %v162_v39, 0.0 }
 0x11c   :  { %v173_v42 = vpack.c.bf16 %v170_v41, %v169_v40 }
 0x11e   :  { %251 = vmatmul.bf16.vlgmr.msrb.gmra.mxu0 %v173_v42 }
 0x125   :  { %v164_v43 = vpop.f32.mrf.mxu3 }
 0x126   :  { %v165_v44 = vadd.f32 %v380_v36, %v164_v43 }
 0x128   :  { %v171_v47 = vmax.f32 %v165_v44, 0.0 }
 0x12d   :  { %v166_v45 = vpop.f32.mrf.mxu3 }
 0x12e   :  { %v167_v46 = vadd.f32 %v380_v36, %v166_v45 }
 0x130   :  { %v172_v48 = vmax.f32 %v167_v46, 0.0 }
 0x132   :  { %v174_v49 = vpack.c.bf16 %v172_v48, %v171_v47 }
 0x134   :  { %256 = vmatmul.bf16.vlgmr.msra.gmra.mxu2 %v174_v49 }
 0x19b   :  { %v252_v51 = vpop.f32.mrf.mxu0 }
 0x19c   :  { %v253_v52 = vadd.f32 %v381_v50, %v252_v51 }
 0x19e   :  { %263 = vst.msk [vmem:[%s507_s7] sm:$0xff] %vm262_vm2, %v253_v52 }
 0x1a3   :  { %v254_v53 = vpop.f32.mrf.mxu0 }
 0x1a4   :  { %v255_v54 = vadd.f32 %v381_v50, %v254_v53 }
 0x1a6   :  { %264 = vst.msk [vmem:[%s507_s7 + $0x8] sm:$0xff] %vm262_vm2, %v255_v54 }
 0x1b7   :  { %v257_v55 = vpop.f32.mrf.mxu2 }
 0x1b8   :  { %v258_v56 = vadd.f32 %v381_v50, %v257_v55 }
 0x1ba   :  { %265 = vst.msk [vmem:[%s507_s7 + $0x10] sm:$0xff] %vm262_vm2, %v258_v56 }
 0x1bf   :  { %v259_v57 = vpop.f32.mrf.mxu2 }
 0x1c0   :  { %v260_v58 = vadd.f32 %v381_v50, %v259_v57 }
 0x1c2   :  { %266 = vst.msk [vmem:[%s507_s7 + $0x18] sm:$0xff] %vm262_vm2, %v260_v58 }

</bundles_post_ra>
